<compile_context>
chip_gen: v7x
topology: tpu7x:2x2x1
jax: 0.10.0
libtpu: 0.0.40
codegen_flags: <defaults>
</compile_context>

<pallas_src>
import functools
from math import sqrt

import jax
import jax.numpy as jnp
from jax.experimental import pallas as pl
from jax.experimental.pallas import tpu as pltpu


# ------------------------------- helpers ----------------------------------- #

def _round_up(n: int, m: int) -> int:
    return ((n + m - 1) // m) * m


def _apply_act(y, act):
    if act is None:
        return y
    if act == "relu":
        return jnp.maximum(y, 0.0)
    if act == "tanh":
        return jnp.tanh(y)
    if act == "sigmoid":
        return jax.nn.sigmoid(y)
    if act == "gelu":
        return jax.nn.gelu(y)
    raise ValueError(f"unknown activation {act!r}")


# ----------------------------- Pallas kernel ------------------------------- #

def _fused_mlp_kernel(*refs, n_layers, acts, fouts_pad):
    # refs = (x_ref, w1_ref, ..., wn_ref, bias_stack_ref, o_ref)
    x_ref = refs[0]
    w_refs = refs[1:1 + n_layers]
    b_ref = refs[1 + n_layers]          # (n_layers, max_fout_pad) f32
    o_ref = refs[2 + n_layers]

    h = x_ref[...].astype(jnp.float32)  # (TB, fin_pad)
    for i in range(n_layers):
        w = w_refs[i][...]              # (Fin_pad_i, Fout_pad_i), bf16 (or f32)
        fo = fouts_pad[i]
        b = b_ref[i:i + 1, :fo]         # (1, Fout_pad_i) f32, broadcast over batch
        y = jnp.dot(h.astype(w.dtype), w, preferred_element_type=jnp.float32) + b
        h = _apply_act(y, acts[i])
    o_ref[...] = h.astype(o_ref.dtype)


def fused_mlp(x_pad, weights_pad, bias_stack, acts, fouts_pad, out_dtype, tb):
    """Whole MLP in one pallas_call; batch-tiled grid, weights/biases VMEM-resident."""
    n_layers = len(weights_pad)
    b_pad, fin_pad = x_pad.shape
    fout_pad = fouts_pad[-1]
    assert b_pad % tb == 0
    n_tiles = b_pad // tb

    # Resident operands: full-array blocks with a constant block index.
    w_specs = [pl.BlockSpec(w.shape, lambda i: (0, 0)) for w in weights_pad]
    b_spec = pl.BlockSpec(bias_stack.shape, lambda i: (0, 0))
    x_spec = pl.BlockSpec((tb, fin_pad), lambda i: (i, 0))
    o_spec = pl.BlockSpec((tb, fout_pad), lambda i: (i, 0))

    # Scoped-VMEM budget: resident params + double-buffered x/out tiles + largest
    # f32 intermediate, with ~25% headroom (clamped to a sane physical range).
    itemsize = jnp.dtype(x_pad.dtype).itemsize
    param_bytes = sum(int(w.size) * jnp.dtype(w.dtype).itemsize for w in weights_pad)
    param_bytes += int(bias_stack.size) * jnp.dtype(bias_stack.dtype).itemsize
    io_bytes = 2 * (tb * fin_pad + tb * fout_pad) * itemsize
    interm_bytes = 2 * tb * max(fouts_pad + (fin_pad,)) * 4
    vmem_limit = int(1.25 * (param_bytes + io_bytes + interm_bytes)) + (4 << 20)
    vmem_limit = min(max(vmem_limit, 8 << 20), 100 << 20)

    kernel = functools.partial(
        _fused_mlp_kernel, n_layers=n_layers, acts=tuple(acts), fouts_pad=tuple(fouts_pad)
    )

    return pl.pallas_call(
        kernel,
        out_shape=jax.ShapeDtypeStruct((b_pad, fout_pad), out_dtype),
        grid_spec=pltpu.PrefetchScalarGridSpec(
            num_scalar_prefetch=0,
            grid=(n_tiles,),
            in_specs=[x_spec] + w_specs + [b_spec],
            out_specs=o_spec,
        ),
        compiler_params=pltpu.CompilerParams(
            dimension_semantics=("parallel",),
            vmem_limit_bytes=vmem_limit,
        ),
    )(x_pad, *weights_pad, bias_stack)


# --------------------------- FCBlockLegacy (JAX) --------------------------- #

class FCBlockLegacyPallas:
    """Mirror of ebtorch FCBlockLegacy: stack of Linear layers, hidden activation
    on all but the last linear, optional output activation on the final result.
    Activations are given as strings ("relu"/"tanh"/...) or None."""

    def __init__(self, fin, hsizes, fout, hactiv, oactiv, bias=True, *,
                 param_dtype=jnp.bfloat16, batch_tile=256, key=None):
        allsizes = [fin] + list(hsizes) + [fout]
        n_lin = len(allsizes) - 1
        if not isinstance(bias, list):
            bias = [bias] * n_lin
        elif len(bias) != n_lin:
            raise RuntimeError("If 'bias' is a list, it must have as many elements as #linears")
        if hactiv is not None and isinstance(hactiv, list) and len(hactiv) != n_lin - 1:
            raise RuntimeError("If 'hactiv' is a list, it must have as many elements as (#linears - 1)")

        self.fin = fin
        self.fout = fout
        self.sizes = allsizes
        self.param_dtype = param_dtype
        self.batch_tile = batch_tile

        # Resolve the per-layer activation chain once (output act fused into last layer).
        acts = []
        for idx in range(n_lin):
            if hactiv is not None and idx < n_lin - 1:
                acts.append(hactiv[idx] if isinstance(hactiv, list) else hactiv)
            elif idx == n_lin - 1:
                acts.append(oactiv)
            else:
                acts.append(None)
        self.acts = acts

        # Parameters (PyTorch nn.Linear default init range). Unpadded f32 copies kept
        # for reference; padded (lane-dense) param_dtype copies are the kernel operands.
        self.weights, self.biases = [], []
        self.weights_pad = []
        key = jax.random.PRNGKey(0) if key is None else key
        for i in range(n_lin):
            key, kw, kb = jax.random.split(key, 3)
            fan_in, fan_out = allsizes[i], allsizes[i + 1]
            bound = 1.0 / sqrt(fan_in)
            w = jax.random.uniform(kw, (fan_in, fan_out), jnp.float32, -bound, bound)
            if bias[i]:
                b = jax.random.uniform(kb, (fan_out,), jnp.float32, -bound, bound)
            else:
                b = jnp.zeros((fan_out,), jnp.float32)
            self.weights.append(w)
            self.biases.append(b)

            fin_p = _round_up(fan_in, 128)
            fout_p = _round_up(fan_out, 128)
            w_pad = jnp.zeros((fin_p, fout_p), jnp.float32).at[:fan_in, :fan_out].set(w)
            self.weights_pad.append(w_pad.astype(param_dtype))

        # Pack all biases into one f32 VMEM operand (single DMA, no per-bias descriptors).
        self.fouts_pad = tuple(w.shape[1] for w in self.weights_pad)
        max_fout_pad = max(self.fouts_pad)
        b_stack = jnp.zeros((n_lin, max_fout_pad), jnp.float32)
        for i, b in enumerate(self.biases):
            b_stack = b_stack.at[i, : b.shape[0]].set(b)
        self.bias_stack = b_stack

    def __call__(self, x):
        B, fin = x.shape
        assert fin == self.fin
        fin_pad = self.weights_pad[0].shape[0]

        # Batch tile: small batches run as a single tile; large batches stream in
        # self.batch_tile-row tiles (weights stay resident across tiles).
        b8 = _round_up(B, 8)
        tb = min(self.batch_tile, b8)
        b_pad = _round_up(b8, tb)

        # TODO(synk): for very large B the batch tail could be handled with in-kernel
        # masking instead of this wrapper-side pad copy to save one x/out HBM pass.
        x_pad = jnp.zeros((b_pad, fin_pad), x.dtype).at[:B, :fin].set(x)
        out_pad = fused_mlp(x_pad, self.weights_pad, self.bias_stack,
                            self.acts, self.fouts_pad, x.dtype, tb)
        return out_pad[:B, : self.fout]


# --------------------------------- main ------------------------------------ #

if __name__ == "__main__":
    # Small shapes consistent with the module: fin=32, two hidden layers, fout=16.
    batch, fin, hsizes, fout = 8, 32, [64, 48], 16

    model = FCBlockLegacyPallas(
        fin=fin, hsizes=hsizes, fout=fout,
        hactiv="relu", oactiv="tanh", bias=True,
        param_dtype=jnp.bfloat16,
        key=jax.random.PRNGKey(0),
    )

    kx = jax.random.PRNGKey(0)
    x = jax.random.normal(kx, (batch, fin), jnp.float32)

    out = model(x)
    jax.block_until_ready(out)

    # Pure-JAX reference emulating the same bf16 weight/activation quantization
    # (products are exact in bf16 x bf16 -> f32, so only accumulation order differs).
    ref = x
    n_lin = len(model.weights)
    for i, (w, b) in enumerate(zip(model.weights, model.biases)):
        wq = w.astype(jnp.bfloat16).astype(jnp.float32)
        hq = ref.astype(jnp.bfloat16).astype(jnp.float32)
        ref = hq @ wq + b
        if i < n_lin - 1:
            ref = jnp.maximum(ref, 0.0)
    ref = jnp.tanh(ref)

    assert out.shape == (batch, fout)
    assert jnp.allclose(out, ref, atol=1e-3, rtol=1e-3), float(jnp.max(jnp.abs(out - ref)))

    print("KERNEL_OK")
</pallas_src>

<mosaic_0001>
module attributes {stable_mosaic.version = 11 : i64} {
  func.func @_fused_mlp_kernel(%arg0: i32, %arg1: memref<8x128xf32, #tpu.memory_space<vmem>>, %arg2: memref<128x128xbf16, #tpu.memory_space<vmem>>, %arg3: memref<128x128xbf16, #tpu.memory_space<vmem>>, %arg4: memref<128x128xbf16, #tpu.memory_space<vmem>>, %arg5: memref<3x128xf32, #tpu.memory_space<vmem>>, %arg6: memref<8x128xf32, #tpu.memory_space<vmem>>) attributes {dimension_semantics = [#tpu.dimension_semantics<parallel>], iteration_bounds = array<i64: 1>, scalar_prefetch = 0 : i64, scratch_operands = 0 : i64, tpu.core_type = #tpu.core_type<tc>, window_params = [{transform_indices = @transform_0, window_bounds = array<i64: 8, 128>}, {pipeline_mode = #tpu.pipeline_mode<synchronous>, transform_indices = @transform_1, window_bounds = array<i64: 128, 128>}, {pipeline_mode = #tpu.pipeline_mode<synchronous>, transform_indices = @transform_2, window_bounds = array<i64: 128, 128>}, {pipeline_mode = #tpu.pipeline_mode<synchronous>, transform_indices = @transform_3, window_bounds = array<i64: 128, 128>}, {pipeline_mode = #tpu.pipeline_mode<synchronous>, transform_indices = @transform_4, window_bounds = array<i64: 3, 128>}, {transform_indices = @transform_5, window_bounds = array<i64: 8, 128>}]} {
    %c0 = arith.constant 0 : index
    %c0_0 = arith.constant 0 : index
    %0 = vector.load %arg1[%c0, %c0_0] : memref<8x128xf32, #tpu.memory_space<vmem>>, vector<8x128xf32>
    %c0_1 = arith.constant 0 : index
    %c0_2 = arith.constant 0 : index
    %1 = vector.load %arg2[%c0_1, %c0_2] : memref<128x128xbf16, #tpu.memory_space<vmem>>, vector<128x128xbf16>
    %c0_3 = arith.constant 0 : index
    %c0_4 = arith.constant 0 : index
    %2 = vector.load %arg5[%c0_3, %c0_4] : memref<3x128xf32, #tpu.memory_space<vmem>>, vector<1x128xf32>
    %3 = arith.truncf %0 : vector<8x128xf32> to vector<8x128xbf16>
    %cst = arith.constant dense<0.000000e+00> : vector<8x128xf32>
    %4 = tpu.matmul %3, %1, %cst {dimension_numbers = #tpu.dot_dimension_numbers<[1], [0], [0], [1], [0, 0, 1, 1], [], []>} : vector<8x128xbf16>, vector<128x128xbf16>, vector<8x128xf32> -> vector<8x128xf32>
    %5 = vector.broadcast %2 : vector<1x128xf32> to vector<8x128xf32>
    %6 = arith.addf %4, %5 : vector<8x128xf32>
    %cst_5 = arith.constant 0.000000e+00 : f32
    %7 = vector.broadcast %cst_5 : f32 to vector<8x128xf32>
    %8 = arith.maximumf %6, %7 : vector<8x128xf32>
    %c0_6 = arith.constant 0 : index
    %c0_7 = arith.constant 0 : index
    %9 = vector.load %arg3[%c0_6, %c0_7] : memref<128x128xbf16, #tpu.memory_space<vmem>>, vector<128x128xbf16>
    %c1 = arith.constant 1 : index
    %c0_8 = arith.constant 0 : index
    %10 = vector.load %arg5[%c1, %c0_8] : memref<3x128xf32, #tpu.memory_space<vmem>>, vector<1x128xf32>
    %11 = arith.truncf %8 : vector<8x128xf32> to vector<8x128xbf16>
    %cst_9 = arith.constant dense<0.000000e+00> : vector<8x128xf32>
    %12 = tpu.matmul %11, %9, %cst_9 {dimension_numbers = #tpu.dot_dimension_numbers<[1], [0], [0], [1], [0, 0, 1, 1], [], []>} : vector<8x128xbf16>, vector<128x128xbf16>, vector<8x128xf32> -> vector<8x128xf32>
    %13 = vector.broadcast %10 : vector<1x128xf32> to vector<8x128xf32>
    %14 = arith.addf %12, %13 : vector<8x128xf32>
    %cst_10 = arith.constant 0.000000e+00 : f32
    %15 = vector.broadcast %cst_10 : f32 to vector<8x128xf32>
    %16 = arith.maximumf %14, %15 : vector<8x128xf32>
    %c0_11 = arith.constant 0 : index
    %c0_12 = arith.constant 0 : index
    %17 = vector.load %arg4[%c0_11, %c0_12] : memref<128x128xbf16, #tpu.memory_space<vmem>>, vector<128x128xbf16>
    %c2 = arith.constant 2 : index
    %c0_13 = arith.constant 0 : index
    %18 = vector.load %arg5[%c2, %c0_13] : memref<3x128xf32, #tpu.memory_space<vmem>>, vector<1x128xf32>
    %19 = arith.truncf %16 : vector<8x128xf32> to vector<8x128xbf16>
    %cst_14 = arith.constant dense<0.000000e+00> : vector<8x128xf32>
    %20 = tpu.matmul %19, %17, %cst_14 {dimension_numbers = #tpu.dot_dimension_numbers<[1], [0], [0], [1], [0, 0, 1, 1], [], []>} : vector<8x128xbf16>, vector<128x128xbf16>, vector<8x128xf32> -> vector<8x128xf32>
    %21 = vector.broadcast %18 : vector<1x128xf32> to vector<8x128xf32>
    %22 = arith.addf %20, %21 : vector<8x128xf32>
    %23 = math.tanh %22 : vector<8x128xf32>
    %c0_15 = arith.constant 0 : index
    %c0_16 = arith.constant 0 : index
    %24 = vector.load %arg6[%c0_15, %c0_16] : memref<8x128xf32, #tpu.memory_space<vmem>>, vector<8x128xf32>
    tpu.vector_store %arg6[%c0_15, %c0_16], %23 {strides = array<i32>} : memref<8x128xf32, #tpu.memory_space<vmem>>, vector<8x128xf32>,
    return
  }
  func.func @transform_0(%arg0: i32) -> (i32, i32) {
    %c0_i32 = arith.constant 0 : i32
    %c0_i32_0 = arith.constant 0 : i32
    return %arg0, %c0_i32 : i32, i32
  }
  func.func @transform_1(%arg0: i32) -> (i32, i32) {
    %c0_i32 = arith.constant 0 : i32
    %c0_i32_0 = arith.constant 0 : i32
    %c0_i32_1 = arith.constant 0 : i32
    return %c0_i32, %c0_i32_0 : i32, i32
  }
  func.func @transform_2(%arg0: i32) -> (i32, i32) {
    %c0_i32 = arith.constant 0 : i32
    %c0_i32_0 = arith.constant 0 : i32
    %c0_i32_1 = arith.constant 0 : i32
    return %c0_i32, %c0_i32_0 : i32, i32
  }
  func.func @transform_3(%arg0: i32) -> (i32, i32) {
    %c0_i32 = arith.constant 0 : i32
    %c0_i32_0 = arith.constant 0 : i32
    %c0_i32_1 = arith.constant 0 : i32
    return %c0_i32, %c0_i32_0 : i32, i32
  }
  func.func @transform_4(%arg0: i32) -> (i32, i32) {
    %c0_i32 = arith.constant 0 : i32
    %c0_i32_0 = arith.constant 0 : i32
    %c0_i32_1 = arith.constant 0 : i32
    return %c0_i32, %c0_i32_0 : i32, i32
  }
  func.func @transform_5(%arg0: i32) -> (i32, i32) {
    %c0_i32 = arith.constant 0 : i32
    %c0_i32_0 = arith.constant 0 : i32
    return %arg0, %c0_i32 : i32, i32
  }
}

</mosaic_0001>

<bundles_post_ra>
// kernel: tpu_custom_call.1
= control target key start
LH: loop header
LB: loop body
LE: loop exit
PB: predicated region body
PF: predicated region fallthrough
CT: control target
= control target key end

     0   :  { %10 = vsyncpa [#allocation3], 0  ;;  %s841_s0 = inlined_call_operand.hbm [shape: f32[8,128], index: 0, kind: input, shape index: {}]   ;;  %s842_s1 = inlined_call_operand.hbm [shape: bf16[128,128], index: 1, kind: input, shape index: {}]   ;;  %s843_s2 = inlined_call_operand.hbm [shape: bf16[128,128], index: 2, kind: input, shape index: {}]   ;;  %s844_s3 = inlined_call_operand.hbm [shape: bf16[128,128], index: 3, kind: input, shape index: {}]   ;;  %s845_s4 = inlined_call_operand.vmem [shape: f32[3,128], index: 4, kind: input, shape index: {}]   ;;  %s846_s5 = inlined_call_operand.hbm [shape: f32[8,128], index: 5, kind: output, shape index: {}]  }
   0x1   :  { %11 = vsyncpa [#allocation6], 0 }
   0x2   :  { %12 = vsyncpa [#allocation9], 0 }
   0x3   :  { %13 = vsyncpa [#allocation4], 0  ;;  %s694_s18 = smov [#allocation5]   ;;  %s576_s22 = scalar_lea.hbm %s842_s1, 1024 }
   0x4   :  { %s29_s19 = sshll.u32 %s694_s18, 4  ;;  %p577_p0 = scmp.ne.s32.totalorder %s842_s1, %s576_s22  ;;  %s30_s19 = int_to_ptr.vmem [resolvable:$true] %s29_s19 }
   0x5   :  { %p580_p1 = scmp.lt.u32.totalorder %s576_s22, %s842_s1 }
   0x7   :  { %p582_p2 = pnand %p580_p1, %p577_p0 }
   0x9   :  { %585 = shalt.err (!%p582_p2)
}
   0xa   :  { %s586_s27 = scalar_lea.vmem %s30_s19, 1024  ;;  %p591_p4 = scmp.lt.s32.totalorder %s30_s19, %s30_s19 }
   0xb   :  { %p587_p3 = scmp.ne.s32.totalorder %s30_s19, %s586_s27  ;;  %p592_p5 = scmp.lt.s32.totalorder %s586_s27, %s586_s27 }
   0xd   :  { %p593_p6 = por %p592_p5, %p591_p4 }
   0xf   :  { %p594_p7 = pnand %p593_p6, %p587_p3 }
  0x11   :  { %597 = shalt.err (!%p594_p7)
}
  0x12   :  { %s695_s28 = smov 64   ;;  %s696_s29 = smov 4  }
  0x13   :  { %35 = dma.hbm_to_vmem [thread:$0]  %s842_s1, 1024, %s30_s19, [#allocation6], %s695_s28, %s695_s28, %s696_s29  }
  0x14   :  { %s697_s7 = smov [#allocation2]   ;;  %s698_s9 = smov [#allocation7]  }
  0x15   :  { %s20_s8 = sshll.u32 %s697_s7, 4  ;;  %s41_s10 = sshll.u32 %s698_s9, 4  ;;  %s21_s8 = int_to_ptr.vmem [resolvable:$true] %s20_s8  ;;  %s42_s10 = int_to_ptr.vmem [resolvable:$true] %s41_s10 }
  0x16   :  { %s598_s13 = scalar_lea.hbm %s841_s0, 128 }
  0x17   :  { %p599_p8 = scmp.ne.s32.totalorder %s841_s0, %s598_s13  ;;  %p602_p9 = scmp.lt.u32.totalorder %s598_s13, %s841_s0 }
  0x19   :  { %p604_p10 = pnand %p602_p9, %p599_p8 }
  0x1b   :  { %607 = shalt.err (!%p604_p10)
}
  0x1c   :  { %s608_s1 = scalar_lea.vmem %s21_s8, 128  ;;  %p613_p12 = scmp.lt.s32.totalorder %s21_s8, %s21_s8 }
  0x1d   :  { %p609_p11 = scmp.ne.s32.totalorder %s21_s8, %s608_s1  ;;  %p614_p13 = scmp.lt.s32.totalorder %s608_s1, %s608_s1 }
  0x1f   :  { %p615_p0 = por %p614_p13, %p613_p12 }
  0x21   :  { %p616_p1 = pnand %p615_p0, %p609_p11 }
  0x23   :  { %619 = shalt.err (!%p616_p1)
}
  0x24   :  { %23 = dma.hbm_to_vmem [thread:$0]  %s841_s0, 128, %s21_s8, [#allocation3]  }
  0x25   :  { %s620_s22 = scalar_lea.hbm %s843_s2, 1024 }
  0x26   :  { %p621_p2 = scmp.ne.s32.totalorder %s843_s2, %s620_s22  ;;  %p624_p3 = scmp.lt.u32.totalorder %s620_s22, %s843_s2 }
  0x28   :  { %p626_p4 = pnand %p624_p3, %p621_p2 }
  0x2a   :  { %629 = shalt.err (!%p626_p4)
}
  0x2b   :  { %s630_s27 = scalar_lea.vmem %s42_s10, 1024  ;;  %p635_p6 = scmp.lt.s32.totalorder %s42_s10, %s42_s10 }
  0x2c   :  { %p631_p5 = scmp.ne.s32.totalorder %s42_s10, %s630_s27  ;;  %p636_p7 = scmp.lt.s32.totalorder %s630_s27, %s630_s27 }
  0x2e   :  { %p637_p8 = por %p636_p7, %p635_p6 }
  0x30   :  { %p638_p9 = pnand %p637_p8, %p631_p5 }
  0x32   :  { %641 = shalt.err (!%p638_p9)
}
  0x33   :  { %47 = dma.hbm_to_vmem [thread:$0]  %s843_s2, 1024, %s42_s10, [#allocation6], %s695_s28, %s695_s28, %s696_s29  }
  0x34   :  { %s699_s6 = smov [#allocation8]   ;;  %s642_s11 = scalar_lea.hbm %s844_s3, 1024 }
  0x35   :  { %s53_s7 = sshll.u32 %s699_s6, 4  ;;  %p643_p10 = scmp.ne.s32.totalorder %s844_s3, %s642_s11  ;;  %s54_s7 = int_to_ptr.vmem [resolvable:$true] %s53_s7 }
  0x36   :  { %p646_p11 = scmp.lt.u32.totalorder %s642_s11, %s844_s3 }
  0x38   :  { %p648_p12 = pnand %p646_p11, %p643_p10 }
  0x3a   :  { %651 = shalt.err (!%p648_p12)
}
  0x3b   :  { %s652_s16 = scalar_lea.vmem %s54_s7, 1024  ;;  %p657_p0 = scmp.lt.s32.totalorder %s54_s7, %s54_s7 }
  0x3c   :  { %p653_p13 = scmp.ne.s32.totalorder %s54_s7, %s652_s16  ;;  %p658_p1 = scmp.lt.s32.totalorder %s652_s16, %s652_s16 }
  0x3e   :  { %p659_p2 = por %p658_p1, %p657_p0 }
  0x40   :  { %p660_p3 = pnand %p659_p2, %p653_p13 }
  0x42   :  { %663 = shalt.err (!%p660_p3)
}
  0x43   :  { %59 = dma.hbm_to_vmem [thread:$0]  %s844_s3, 1024, %s54_s7, [#allocation9], %s695_s28, %s695_s28, %s696_s29  }
  0x44   :  { %686 = dma.done.wait [#allocation3], 128  }
  0x45   :  { %687 = vsyncadd [#allocation3], 4294967168 }
  0x46   :  { %688 = dma.done.wait [#allocation6], 2048  }
  0x47   :  { %689 = vsyncadd [#allocation6], 4294965248 }
  0x48   :  { %690 = dma.done.wait [#allocation9], 1024  }
  0x49   :  { %691 = vsyncadd [#allocation9], 4294966272  ;;  %v700_v0 = vmov 0.0   ;;  %vm701_vm0 = vmmov 0   ;;  %v550_v1 = vld [vmem:[#allocation5] sm:$0xff]   ;;  %v551_v2 = vld [vmem:[#allocation5 + $0x8] sm:$0xff]  }
  0x4a   :  { %481 = vmatprep.subr.bf16.mxu0 %v700_v0  ;;  %497 = vmatprep.mubr.msk.bf16.mxu0 %vm701_vm0, %v700_v0  ;;  %v552_v3 = vld [vmem:[#allocation5 + $0x10] sm:$0xff]   ;;  %v558_v4 = vld [vmem:[#allocation7] sm:$0xff]   ;;  %v553_v5 = vld [vmem:[#allocation5 + $0x18] sm:$0xff]   ;;  %s702_s19 = smov [#allocation10]  }
  0x4b   :  { %501 = vmatprep.subr.bf16.mxu1 %v700_v0  ;;  %517 = vmatprep.mubr.msk.bf16.mxu1 %vm701_vm0, %v700_v0  ;;  %v559_v6 = vld [vmem:[#allocation7 + $0x8] sm:$0xff]   ;;  %v554_v7 = vld [vmem:[#allocation5 + $0x20] sm:$0xff]   ;;  %v560_v8 = vld [vmem:[#allocation7 + $0x10] sm:$0xff]   ;;  %s416_s20 = sshll.u32 %s702_s19, 4  ;;  %s417_s20 = int_to_ptr.vmem [resolvable:$true] %s416_s20 }
  0x4c   :  { %482 = vmatpush3.bf16.msra.mxu0 %v550_v1  ;;  %502 = vmatpush3.bf16.msra.mxu1 %v558_v4  ;;  %v555_v9 = vld [vmem:[#allocation5 + $0x28] sm:$0xff]   ;;  %v561_v10 = vld [vmem:[#allocation7 + $0x18] sm:$0xff]   ;;  %v556_v11 = vld [vmem:[#allocation5 + $0x30] sm:$0xff]   ;;  %s664_s21 = scalar_lea.vmem %s417_s20, 128  ;;  %p669_p5 = scmp.lt.s32.totalorder %s417_s20, %s417_s20 }
  0x4d   :  { %483 = vmatprep.subr.bf16.mxu0 %v700_v0  ;;  %503 = vmatprep.subr.bf16.mxu1 %v700_v0  ;;  %v562_v12 = vld [vmem:[#allocation7 + $0x20] sm:$0xff]   ;;  %v557_v13 = vld [vmem:[#allocation5 + $0x38] sm:$0xff]   ;;  %v563_v15 = vld [vmem:[#allocation7 + $0x28] sm:$0xff]   ;;  %p665_p4 = scmp.ne.s32.totalorder %s417_s20, %s664_s21  ;;  %p670_p6 = scmp.lt.s32.totalorder %s664_s21, %s664_s21 }
  0x4e   :  { %v75_v14 = vld [vmem:[#allocation2] sm:$0xff]  ;;  %v564_v17 = vld [vmem:[#allocation7 + $0x30] sm:$0xff]   ;;  %v566_v19 = vld [vmem:[#allocation8] sm:$0xff]  }
  0x4f   :  { %v93_v16 = vpack.c.bf16 %v75_v14, %v75_v14  ;;  %v565_v18 = vld [vmem:[#allocation7 + $0x38] sm:$0xff]   ;;  %v567_v20 = vld [vmem:[#allocation8 + $0x8] sm:$0xff]   ;;  %v568_v21 = vld [vmem:[#allocation8 + $0x10] sm:$0xff]   ;;  %p671_p7 = por %p670_p6, %p669_p5 }
  0x50   :  { %484 = vmatpush3.bf16.msra.mxu0 %v551_v2  ;;  %504 = vmatpush3.bf16.msra.mxu1 %v559_v6  ;;  %v569_v22 = vld [vmem:[#allocation8 + $0x18] sm:$0xff]   ;;  %v570_v23 = vld [vmem:[#allocation8 + $0x20] sm:$0xff]   ;;  %v571_v24 = vld [vmem:[#allocation8 + $0x28] sm:$0xff]  }
  0x51   :  { %485 = vmatprep.subr.bf16.mxu0 %v700_v0  ;;  %505 = vmatprep.subr.bf16.mxu1 %v700_v0  ;;  %v427_v25 = vld [vmem:[%s845_s4] ss:$0 sm:$0xff]  ;;  %v572_v33 = vld [vmem:[#allocation8 + $0x30] sm:$0xff]   ;;  %v436_v35 = vld [vmem:[%s845_s4 + $0x1] ss:$0 sm:$0xff]  ;;  %p672_p8 = pnand %p671_p7, %p665_p4 }
  0x52   :  { %v573_v34 = vld [vmem:[#allocation8 + $0x38] sm:$0xff]  }
  0x53   :  { %v445_v43 = vld [vmem:[%s845_s4 + $0x2] ss:$0 sm:$0xff] }
  0x54   :  { %486 = vmatpush3.bf16.msra.mxu0 %v552_v3  ;;  %506 = vmatpush3.bf16.msra.mxu1 %v560_v8 }
  0x55   :  { %487 = vmatprep.subr.bf16.mxu0 %v700_v0  ;;  %507 = vmatprep.subr.bf16.mxu1 %v700_v0 }
  0x58   :  { %488 = vmatpush3.bf16.msra.mxu0 %v553_v5  ;;  %508 = vmatpush3.bf16.msra.mxu1 %v561_v10 }
  0x59   :  { %489 = vmatprep.subr.bf16.mxu0 %v700_v0  ;;  %509 = vmatprep.subr.bf16.mxu1 %v700_v0 }
  0x5c   :  { %490 = vmatpush3.bf16.msra.mxu0 %v554_v7  ;;  %510 = vmatpush3.bf16.msra.mxu1 %v562_v12 }
  0x5d   :  { %491 = vmatprep.subr.bf16.mxu0 %v700_v0  ;;  %511 = vmatprep.subr.bf16.mxu1 %v700_v0 }
  0x60   :  { %492 = vmatpush3.bf16.msra.mxu0 %v555_v9  ;;  %512 = vmatpush3.bf16.msra.mxu1 %v563_v15 }
  0x61   :  { %493 = vmatprep.subr.bf16.mxu0 %v700_v0  ;;  %513 = vmatprep.subr.bf16.mxu1 %v700_v0 }
  0x64   :  { %494 = vmatpush3.bf16.msra.mxu0 %v556_v11  ;;  %514 = vmatpush3.bf16.msra.mxu1 %v564_v17 }
  0x65   :  { %495 = vmatprep.subr.bf16.mxu0 %v700_v0  ;;  %515 = vmatprep.subr.bf16.mxu1 %v700_v0 }
  0x68   :  { %496 = vmatpush3.bf16.msra.mxu0 %v557_v13  ;;  %516 = vmatpush3.bf16.msra.mxu1 %v565_v18 }
  0x69   :  { %521 = vmatprep.subr.bf16.mxu0 %v700_v0 }
  0x6b   :  { %498 = vmatmul.mubr.bf16.vlgmr.msra.gmra.mrb[0].mxu0 %v93_v16 }
  0x6c   :  { %537 = vmatprep.mubr.msk.bf16.mxu0 %vm701_vm0, %v700_v0  ;;  %522 = vmatpush3.bf16.msra.mxu0 %v566_v19 }
  0x6d   :  { %523 = vmatprep.subr.bf16.mxu0 %v700_v0 }
  0x70   :  { %524 = vmatpush3.bf16.msra.mxu0 %v567_v20 }
  0x71   :  { %525 = vmatprep.subr.bf16.mxu0 %v700_v0 }
  0x74   :  { %526 = vmatpush3.bf16.msra.mxu0 %v568_v21 }
  0x75   :  { %527 = vmatprep.subr.bf16.mxu0 %v700_v0 }
  0x78   :  { %528 = vmatpush3.bf16.msra.mxu0 %v569_v22 }
  0x79   :  { %529 = vmatprep.subr.bf16.mxu0 %v700_v0 }
  0x7c   :  { %530 = vmatpush3.bf16.msra.mxu0 %v570_v23 }
  0x7d   :  { %531 = vmatprep.subr.bf16.mxu0 %v700_v0 }
  0x80   :  { %532 = vmatpush3.bf16.msra.mxu0 %v571_v24 }
  0x81   :  { %533 = vmatprep.subr.bf16.mxu0 %v700_v0 }
  0x84   :  { %534 = vmatpush3.bf16.msra.mxu0 %v572_v33 }
  0x85   :  { %535 = vmatprep.subr.bf16.mxu0 %v700_v0 }
  0x88   :  { %536 = vmatpush3.bf16.msra.mxu0 %v573_v34 }
 0x13e   :  { %v180_v26 = vpop.f32.mrb[0].mxu0 }
 0x13f   :  { %v181_v27 = vadd.f32 %v427_v25, %v180_v26  ;;  %v499_v28 = vpop.f32.mrb[1].mxu0 }
 0x140   :  { %v183_v29 = vpop.f32.mrb[2].mxu0 }
 0x141   :  { %v186_v30 = vmax.f32 %v181_v27, 0.0  ;;  %v500_v31 = vpop.f32.mrb[3].mxu0 }
 0x143   :  { %v204_v32 = vpack.c.bf16 %v186_v30, %v186_v30 }
 0x145   :  { %518 = vmatmul.mubr.bf16.vlgmr.msra.gmra.mrb[0].mxu1 %v204_v32 }
 0x218   :  { %v291_v36 = vpop.f32.mrb[0].mxu1 }
 0x219   :  { %v292_v37 = vadd.f32 %v436_v35, %v291_v36  ;;  %v519_v38 = vpop.f32.mrb[1].mxu1 }
 0x21a   :  { %v294_v39 = vpop.f32.mrb[2].mxu1 }
 0x21b   :  { %v297_v40 = vmax.f32 %v292_v37, 0.0  ;;  %v520_v41 = vpop.f32.mrb[3].mxu1 }
 0x21d   :  { %v315_v42 = vpack.c.bf16 %v297_v40, %v297_v40 }
 0x21f   :  { %538 = vmatmul.mubr.bf16.vlgmr.msra.gmra.mrb[4].mxu0 %v315_v42 }
 0x2f2   :  { %v402_v44 = vpop.f32.mrb[4].mxu0 }
 0x2f3   :  { %v403_v45 = vadd.f32 %v445_v43, %v402_v44  ;;  %v539_v46 = vpop.f32.mrb[5].mxu0 }
 0x2f4   :  { %v405_v47 = vpop.f32.mrb[6].mxu0 }
 0x2f5   :  { %574 = vtanh.f32 %v403_v45  ;;  %v540_v48 = vpop.f32.mrb[7].mxu0 }
 0x2ff   :  { %v575_v49 = vpop.eup %574 }
 0x300   :  { %409 = vst [vmem:[#allocation10] sm:$0xff] %v575_v49 }
 0x301   :  { %675 = shalt.err (!%p672_p8)
}
 0x302   :  { %s676_s23 = scalar_lea.hbm %s846_s5, 128 }
 0x303   :  { %p677_p9 = scmp.ne.s32.totalorder %s846_s5, %s676_s23  ;;  %p680_p10 = scmp.lt.u32.totalorder %s676_s23, %s846_s5 }
 0x305   :  { %p682_p11 = pnand %p680_p10, %p677_p9 }
 0x307   :  { %685 = shalt.err (!%p682_p11)
}
 0x308   :  { %419 = dma.vmem_to_hbm [thread:$0]  %s417_s20, 128, %s846_s5, [#allocation4]  }
 0x309   :  { %692 = dma.done.wait [#allocation4], 128  }
 0x30a   :  { %693 = vsyncadd [#allocation4], 4294967168 }
 0x30b   :  { %423 = vsyncpa [#allocation3], 1 }
 0x30c   :  { %424 = vsyncpa [#allocation6], 1 }
 0x30d   :  { %425 = vsyncpa [#allocation9], 1 }
 0x30e   :  { %426 = vsyncpa [#allocation4], 1 }

</bundles_post_ra>
